<compile_context>
chip_gen: v5e
topology: v5e:2x2
jax: 0.10.0
libtpu: 0.0.40
codegen_flags: <defaults>
</compile_context>

<pallas_src>
import functools

import jax
import jax.numpy as jnp
from jax.experimental import pallas as pl
from jax.experimental.pallas import tpu as pltpu


def _cdiv(a, b):
    return -(-a // b)


def _round_up(x, m):
    return _cdiv(x, m) * m


# Stay well inside v7x's 64 MiB physical VMEM (the smallest of v5e/v6e/v7x).
_VMEM_BUDGET_BYTES = 40 * 1024 * 1024


def _mlp_kernel_out1(x_ref, w1_ref, b1_ref, w2row_ref, b2_ref, o_ref):
    """Specialized kernel for output_dim == 1 (the module default)."""
    # inputs.float(): cast x to the matmul dtype (f32 normally, bf16 if the
    # wrapper opted into the bf16 MXU path).
    x = x_ref[...].astype(w1_ref.dtype)
    # Layer 1: (TILE_B, D) @ (D, H) on the MXU, f32 accumulation.
    h = jnp.dot(x, w1_ref[...], preferred_element_type=jnp.float32)
    h = jnp.maximum(h + b1_ref[...], 0.0)          # bias + ReLU on the VPU
    # Layer 2 (H -> 1): VPU multiply + lane reduction instead of a 1-lane-wide
    # MXU matmul; bias is a single SMEM scalar.
    out = jnp.sum(h * w2row_ref[...], axis=-1, keepdims=True) + b2_ref[0]
    o_ref[...] = out.astype(o_ref.dtype)


def _mlp_kernel_general(x_ref, w1_ref, b1_ref, w2_ref, b2_ref, o_ref):
    """Fallback kernel for output_dim > 1."""
    x = x_ref[...].astype(w1_ref.dtype)
    h = jnp.dot(x, w1_ref[...], preferred_element_type=jnp.float32)
    h = jnp.maximum(h + b1_ref[...], 0.0)
    out = jnp.dot(h, w2_ref[...], preferred_element_type=jnp.float32)
    o_ref[...] = (out + b2_ref[...]).astype(o_ref.dtype)


@functools.partial(jax.jit, static_argnames=("tile_b", "use_bf16_matmul"))
def build_model_forward(x, w1, b1, w2, b2, *, tile_b=4096, use_bf16_matmul=False):
    """2-layer MLP forward as one batch-pipelined Pallas kernel.

    x:  (B, input_dim)          any int/float dtype (promoted like .float())
    w1: (input_dim, hidden_dim) b1: (1, hidden_dim)
    w2: (hidden_dim, out_dim)   b2: (1, out_dim)
    Weights are stored transposed vs. PyTorch so the kernel computes x @ W + b.
    returns: (B, out_dim) float32

    use_bf16_matmul=True casts W1 (and the x tile in-kernel) to bf16 with f32
    accumulation: single-pass MXU on v5e, at a small numerics deviation from
    the f32 PyTorch reference.  Default False = exact .float() semantics.
    """
    B, in_dim = x.shape
    hid = w1.shape[1]
    out_dim = w2.shape[1]

    if use_bf16_matmul:
        w1 = w1.astype(jnp.bfloat16)
    else:
        w1 = w1.astype(jnp.float32)
    b1 = b1.astype(jnp.float32)
    w2 = w2.astype(jnp.float32)
    b2 = b2.astype(jnp.float32)

    itemsize = jnp.dtype(x.dtype).itemsize
    # dtype-aware sublane multiple: 8 rows (4B), 16 (2B), 32 (1B dtypes).
    sub = max(8, 32 // max(itemsize, 1))

    # ---- batch tile selection (no wrapper-side padding) -------------------
    b_ceil = _round_up(B, sub)
    tb = min(tile_b, b_ceil)

    # Cap tb so the double-buffered x tile (+ output tile + resident weights)
    # stays inside the VMEM budget.
    w_bytes = (in_dim * hid * jnp.dtype(w1.dtype).itemsize
               + (hid + hid * out_dim + out_dim) * 4)
    row_bytes = in_dim * itemsize + out_dim * 4
    max_rows = (_VMEM_BUDGET_BYTES - 2 * w_bytes - (2 << 20)) // (2 * row_bytes)
    tb = min(tb, max(sub, (max_rows // sub) * sub))

    # If the whole (large) batch would fit in one tile, split it in two so
    # v7x's two TensorCores both get work (negligible cost on v5e/v6e).
    if tb >= b_ceil and b_ceil >= 2048:
        tb = _round_up(_cdiv(b_ceil, 2), sub)

    tb = _round_up(max(tb, sub), sub)
    grid = (_cdiv(B, tb),)

    # ---- VMEM limit: 2x x-tile + 2x out-tile + 2x weights + margin --------
    vmem_need = 2 * tb * row_bytes + 2 * w_bytes + (2 << 20)
    vmem_limit = int(min(max(vmem_need, 16 << 20), 48 << 20))

    cparams = pltpu.CompilerParams(
        dimension_semantics=("parallel",),
        vmem_limit_bytes=vmem_limit,
    )
    cost = pl.CostEstimate(
        flops=2 * B * in_dim * hid + 2 * B * hid * out_dim,
        bytes_accessed=B * in_dim * itemsize + w_bytes + B * out_dim * 4,
        transcendentals=0,
    )

    x_spec = pl.BlockSpec((tb, in_dim), lambda i: (i, 0))       # streamed
    w1_spec = pl.BlockSpec((in_dim, hid), lambda i: (0, 0))     # resident
    b1_spec = pl.BlockSpec((1, hid), lambda i: (0, 0))          # resident
    out_spec = pl.BlockSpec((tb, out_dim), lambda i: (i, 0))
    out_shape = jax.ShapeDtypeStruct((B, out_dim), jnp.float32)

    if out_dim == 1:
        w2row = w2.reshape(1, hid)                              # lane-dense row
        b2_s = b2.reshape(-1)                                   # 1-D SMEM scalar
        out = pl.pallas_call(
            _mlp_kernel_out1,
            out_shape=out_shape,
            grid=grid,
            in_specs=[
                x_spec,
                w1_spec,
                b1_spec,
                pl.BlockSpec((1, hid), lambda i: (0, 0)),       # w2 row, resident
                pl.BlockSpec(memory_space=pltpu.SMEM),          # b2 scalar
            ],
            out_specs=out_spec,
            compiler_params=cparams,
            cost_estimate=cost,
        )(x, w1, b1, w2row, b2_s)
    else:
        out = pl.pallas_call(
            _mlp_kernel_general,
            out_shape=out_shape,
            grid=grid,
            in_specs=[
                x_spec,
                w1_spec,
                b1_spec,
                pl.BlockSpec((hid, out_dim), lambda i: (0, 0)),
                pl.BlockSpec((1, out_dim), lambda i: (0, 0)),
            ],
            out_specs=out_spec,
            compiler_params=cparams,
            cost_estimate=cost,
        )(x, w1, b1, w2, b2)

    return out


def init_params(key, input_dim=512, hidden_dim=128, output_dim=1):
    """Deterministic init mimicking nn.Linear's uniform(-1/sqrt(fan_in), +)."""
    k1, k2, k3, k4 = jax.random.split(key, 4)
    bound1 = 1.0 / (input_dim ** 0.5)
    bound2 = 1.0 / (hidden_dim ** 0.5)
    # Stored transposed relative to PyTorch: (in_features, out_features).
    w1 = jax.random.uniform(k1, (input_dim, hidden_dim), jnp.float32, -bound1, bound1)
    b1 = jax.random.uniform(k2, (1, hidden_dim), jnp.float32, -bound1, bound1)
    w2 = jax.random.uniform(k3, (hidden_dim, output_dim), jnp.float32, -bound2, bound2)
    b2 = jax.random.uniform(k4, (1, output_dim), jnp.float32, -bound2, bound2)
    return w1, b1, w2, b2


if __name__ == "__main__":
    key = jax.random.PRNGKey(0)
    kx, kp, kx2 = jax.random.split(key, 3)

    INPUT_DIM, HIDDEN_DIM = 512, 128

    def ref_fwd(x, w1, b1, w2, b2):
        h = jnp.maximum(x.astype(jnp.float32) @ w1 + b1, 0.0)
        return h @ w2 + b2

    # Case 1: module defaults (output_dim=1), small aligned batch.
    w1, b1, w2, b2 = init_params(kp, INPUT_DIM, HIDDEN_DIM, 1)
    x = jax.random.normal(kx, (8, INPUT_DIM), dtype=jnp.float32)
    out = jax.block_until_ready(build_model_forward(x, w1, b1, w2, b2))
    ref = ref_fwd(x, w1, b1, w2, b2)
    assert out.shape == (8, 1), out.shape
    assert jnp.allclose(out, ref, atol=1e-4, rtol=1e-4), \
        float(jnp.max(jnp.abs(out - ref)))

    # Case 2: non-tile-aligned batch -> multi-step grid with a partial edge
    # block (exercises the no-pad path).
    x2 = jax.random.normal(kx2, (13, INPUT_DIM), dtype=jnp.float32)
    out2 = jax.block_until_ready(build_model_forward(x2, w1, b1, w2, b2, tile_b=8))
    ref2 = ref_fwd(x2, w1, b1, w2, b2)
    assert out2.shape == (13, 1), out2.shape
    assert jnp.allclose(out2, ref2, atol=1e-4, rtol=1e-4), \
        float(jnp.max(jnp.abs(out2 - ref2)))

    # Case 3: output_dim > 1 fallback kernel.
    w1m, b1m, w2m, b2m = init_params(jax.random.PRNGKey(1), INPUT_DIM, HIDDEN_DIM, 4)
    out3 = jax.block_until_ready(build_model_forward(x, w1m, b1m, w2m, b2m))
    ref3 = ref_fwd(x, w1m, b1m, w2m, b2m)
    assert out3.shape == (8, 4), out3.shape
    assert jnp.allclose(out3, ref3, atol=1e-4, rtol=1e-4), \
        float(jnp.max(jnp.abs(out3 - ref3)))

    print("KERNEL_OK")
</pallas_src>

<mosaic_0001>
module attributes {stable_mosaic.version = 11 : i64} {
  func.func @_mlp_kernel_out1(%arg0: i32, %arg1: memref<8x512xf32, #tpu.memory_space<vmem>>, %arg2: memref<512x128xf32, #tpu.memory_space<vmem>>, %arg3: memref<1x128xf32, #tpu.memory_space<vmem>>, %arg4: memref<1x128xf32, #tpu.memory_space<vmem>>, %arg5: memref<1xf32, #tpu.memory_space<smem>>, %arg6: memref<8x1xf32, #tpu.memory_space<vmem>>) attributes {dimension_semantics = [#tpu.dimension_semantics<parallel>], iteration_bounds = array<i64: 1>, scalar_prefetch = 0 : i64, scratch_operands = 0 : i64, tpu.core_type = #tpu.core_type<tc>, window_params = [{transform_indices = @transform_0, window_bounds = array<i64: 8, 512>}, {pipeline_mode = #tpu.pipeline_mode<synchronous>, transform_indices = @transform_1, window_bounds = array<i64: 512, 128>}, {pipeline_mode = #tpu.pipeline_mode<synchronous>, transform_indices = @transform_2, window_bounds = array<i64: 1, 128>}, {pipeline_mode = #tpu.pipeline_mode<synchronous>, transform_indices = @transform_3, window_bounds = array<i64: 1, 128>}, {transform_indices = @transform_4, window_bounds = array<i64: 1>}, {transform_indices = @transform_5, window_bounds = array<i64: 8, 1>}]} {
    %c0 = arith.constant 0 : index
    %c0_0 = arith.constant 0 : index
    %0 = vector.load %arg1[%c0, %c0_0] : memref<8x512xf32, #tpu.memory_space<vmem>>, vector<8x512xf32>
    %c0_1 = arith.constant 0 : index
    %c0_2 = arith.constant 0 : index
    %1 = vector.load %arg2[%c0_1, %c0_2] : memref<512x128xf32, #tpu.memory_space<vmem>>, vector<512x128xf32>
    %cst = arith.constant dense<0.000000e+00> : vector<8x128xf32>
    %2 = tpu.matmul %0, %1, %cst {dimension_numbers = #tpu.dot_dimension_numbers<[1], [0], [0], [1], [0, 0, 1, 1], [], []>} : vector<8x512xf32>, vector<512x128xf32>, vector<8x128xf32> -> vector<8x128xf32>
    %c0_3 = arith.constant 0 : index
    %c0_4 = arith.constant 0 : index
    %3 = vector.load %arg3[%c0_3, %c0_4] : memref<1x128xf32, #tpu.memory_space<vmem>>, vector<1x128xf32>
    %4 = vector.broadcast %3 : vector<1x128xf32> to vector<8x128xf32>
    %5 = arith.addf %2, %4 : vector<8x128xf32>
    %cst_5 = arith.constant 0.000000e+00 : f32
    %6 = vector.broadcast %cst_5 : f32 to vector<8x128xf32>
    %7 = arith.maximumf %5, %6 : vector<8x128xf32>
    %c0_6 = arith.constant 0 : index
    %c0_7 = arith.constant 0 : index
    %8 = vector.load %arg4[%c0_6, %c0_7] : memref<1x128xf32, #tpu.memory_space<vmem>>, vector<1x128xf32>
    %9 = vector.broadcast %8 : vector<1x128xf32> to vector<8x128xf32>
    %10 = arith.mulf %7, %9 : vector<8x128xf32>
    %cst_8 = arith.constant dense<0.000000e+00> : vector<8xf32>
    %11 = vector.multi_reduction <add>, %10, %cst_8 [1] : vector<8x128xf32> to vector<8xf32>
    %12 = vector.shape_cast %11 : vector<8xf32> to vector<8x1xf32>
    %c0_9 = arith.constant 0 : index
    %13 = memref.load %arg5[%c0_9] : memref<1xf32, #tpu.memory_space<smem>>
    %14 = vector.broadcast %13 : f32 to vector<8x1xf32>
    %15 = arith.addf %12, %14 : vector<8x1xf32>
    %c0_10 = arith.constant 0 : index
    %c0_11 = arith.constant 0 : index
    %16 = vector.load %arg6[%c0_10, %c0_11] : memref<8x1xf32, #tpu.memory_space<vmem>>, vector<8x1xf32>
    tpu.vector_store %arg6[%c0_10, %c0_11], %15 {strides = array<i32>} : memref<8x1xf32, #tpu.memory_space<vmem>>, vector<8x1xf32>,
    return
  }
  func.func @transform_0(%arg0: i32) -> (i32, i32) {
    %c0_i32 = arith.constant 0 : i32
    %c0_i32_0 = arith.constant 0 : i32
    return %arg0, %c0_i32 : i32, i32
  }
  func.func @transform_1(%arg0: i32) -> (i32, i32) {
    %c0_i32 = arith.constant 0 : i32
    %c0_i32_0 = arith.constant 0 : i32
    %c0_i32_1 = arith.constant 0 : i32
    return %c0_i32, %c0_i32_0 : i32, i32
  }
  func.func @transform_2(%arg0: i32) -> (i32, i32) {
    %c0_i32 = arith.constant 0 : i32
    %c0_i32_0 = arith.constant 0 : i32
    %c0_i32_1 = arith.constant 0 : i32
    return %c0_i32, %c0_i32_0 : i32, i32
  }
  func.func @transform_3(%arg0: i32) -> (i32, i32) {
    %c0_i32 = arith.constant 0 : i32
    %c0_i32_0 = arith.constant 0 : i32
    %c0_i32_1 = arith.constant 0 : i32
    return %c0_i32, %c0_i32_0 : i32, i32
  }
  func.func @transform_4(%arg0: i32) -> i32 {
    %c0_i32 = arith.constant 0 : i32
    %c0_i32_0 = arith.constant 0 : i32
    return %c0_i32 : i32
  }
  func.func @transform_5(%arg0: i32) -> (i32, i32) {
    %c0_i32 = arith.constant 0 : i32
    %c0_i32_0 = arith.constant 0 : i32
    return %arg0, %c0_i32 : i32, i32
  }
}

</mosaic_0001>

<bundles_post_ra>
// kernel: build_model_forward.1
= control target key start
LH: loop header
LB: loop body
LE: loop exit
PB: predicated region body
PF: predicated region fallthrough
CT: control target
= control target key end

     0   :  { %11 = vsyncpa [#allocation4], 0  ;;  %s332_s0 = inlined_call_operand.hbm [shape: f32[8,512], index: 0, kind: input, shape index: {}]   ;;  %s333_s1 = inlined_call_operand.hbm [shape: f32[512,128], index: 1, kind: input, shape index: {}]   ;;  %s334_s2 = inlined_call_operand.vmem [shape: f32[1,128], index: 2, kind: input, shape index: {}]   ;;  %s335_s3 = inlined_call_operand.vmem [shape: f32[1,128], index: 3, kind: input, shape index: {}]   ;;  %s336_s4 = inlined_call_operand.<no memory space> [shape: f32[1], index: 4, kind: input, shape index: {}]   ;;  %s337_s5 = inlined_call_operand.vmem [shape: f32[8,1], index: 5, kind: output, shape index: {}]  }
   0x1   :  { %s18_s20 = sshll.u32 %s332_s0, 4  ;;  %s19_s20 = int_to_ptr.hbm [resolvable:$true] %s18_s20 }
   0x2   :  { %12 = vsyncpa [#allocation6], 0  ;;  %s280_s21 = smov [#allocation3]   ;;  %s28_s25 = sshll.u32 %s333_s1, 4  ;;  %s29_s25 = int_to_ptr.hbm [resolvable:$true] %s28_s25 }
   0x3   :  { %s20_s22 = sshll.u32 %s280_s21, 4  ;;  %s281_s26 = smov [#allocation5]   ;;  %s21_s22 = int_to_ptr.vmem [resolvable:$true] %s20_s22 }
   0x4   :  { %23 = dma.hbm_to_vmem [thread:$0]  %s19_s20, 512, %s21_s22, [#allocation4]  }
   0x5   :  { %s30_s27 = sshll.u32 %s281_s26, 4  ;;  %s282_s28 = smov 128   ;;  %s31_s27 = int_to_ptr.vmem [resolvable:$true] %s30_s27 }
   0x6   :  { %s283_s29 = smov 8  }
   0x7   :  { %36 = dma.hbm_to_vmem [thread:$0]  %s29_s25, 8192, %s31_s27, [#allocation6], %s282_s28, %s282_s28, %s283_s29  }
   0x8   :  { %276 = dma.done.wait [#allocation4], 512  }
   0x9   :  { %277 = vsyncadd [#allocation4], 4294966784 }
   0xa   :  { %278 = dma.done.wait [#allocation6], 8192  }
   0xb   :  { %279 = vsyncadd [#allocation6], 4294959104  ;;  %v102_v0 = vld [vmem:[#allocation5 + $0x178] sm:$0xff]  ;;  %v101_v2 = vld [vmem:[#allocation5 + $0x170] sm:$0xff]  ;;  %vm214_vm0 = vcmask 7168  }
   0xc   :  { %v70_v1 = vld [vmem:[#allocation5 + $0x78] sm:$0xff]  ;;  %163 = vmatpush.msra.mxu2 %v102_v0  ;;  %v69_v4 = vld [vmem:[#allocation5 + $0x70] sm:$0xff]  ;;  %v100_v6 = vld [vmem:[#allocation5 + $0x168] sm:$0xff] }
   0xd   :  { %123 = vmatpush.msra.mxu0 %v70_v1  ;;  %v118_v3 = vld [vmem:[#allocation5 + $0x1f8] sm:$0xff]  ;;  %v117_v7 = vld [vmem:[#allocation5 + $0x1f0] sm:$0xff]  ;;  %v68_v8 = vld [vmem:[#allocation5 + $0x68] sm:$0xff] }
   0xe   :  { %v86_v5 = vld [vmem:[#allocation5 + $0xf8] sm:$0xff]  ;;  %183 = vmatpush.msra.mxu3 %v118_v3  ;;  %164 = vmatpush.msra.mxu2 %v101_v2  ;;  %v85_v9 = vld [vmem:[#allocation5 + $0xf0] sm:$0xff]  ;;  %v116_v10 = vld [vmem:[#allocation5 + $0x1e8] sm:$0xff] }
   0xf   :  { %143 = vmatpush.msra.mxu1 %v86_v5  ;;  %124 = vmatpush.msra.mxu0 %v69_v4  ;;  %v99_v11 = vld [vmem:[#allocation5 + $0x160] sm:$0xff]  ;;  %v84_v13 = vld [vmem:[#allocation5 + $0xe8] sm:$0xff]  ;;  %v98_v16 = vld [vmem:[#allocation5 + $0x158] sm:$0xff] }
  0x10   :  { %184 = vmatpush.msra.mxu3 %v117_v7  ;;  %v67_v12 = vld [vmem:[#allocation5 + $0x60] sm:$0xff]  ;;  %165 = vmatpush.msra.mxu2 %v100_v6  ;;  %v66_v17 = vld [vmem:[#allocation5 + $0x58] sm:$0xff]  ;;  %v97_v20 = vld [vmem:[#allocation5 + $0x150] sm:$0xff] }
  0x11   :  { %144 = vmatpush.msra.mxu1 %v85_v9  ;;  %125 = vmatpush.msra.mxu0 %v68_v8  ;;  %v115_v14 = vld [vmem:[#allocation5 + $0x1e0] sm:$0xff]  ;;  %v114_v18 = vld [vmem:[#allocation5 + $0x1d8] sm:$0xff]  ;;  %v65_v21 = vld [vmem:[#allocation5 + $0x50] sm:$0xff] }
  0x12   :  { %v83_v15 = vld [vmem:[#allocation5 + $0xe0] sm:$0xff]  ;;  %185 = vmatpush.msra.mxu3 %v116_v10  ;;  %166 = vmatpush.msra.mxu2 %v99_v11  ;;  %v82_v19 = vld [vmem:[#allocation5 + $0xd8] sm:$0xff]  ;;  %v113_v22 = vld [vmem:[#allocation5 + $0x1d0] sm:$0xff] }
  0x13   :  { %145 = vmatpush.msra.mxu1 %v84_v13  ;;  %126 = vmatpush.msra.mxu0 %v67_v12  ;;  %v81_v23 = vld [vmem:[#allocation5 + $0xd0] sm:$0xff]  ;;  %v96_v24 = vld [vmem:[#allocation5 + $0x148] sm:$0xff]  ;;  %v95_v28 = vld [vmem:[#allocation5 + $0x140] sm:$0xff] }
  0x14   :  { %186 = vmatpush.msra.mxu3 %v115_v14  ;;  %167 = vmatpush.msra.mxu2 %v98_v16  ;;  %v64_v25 = vld [vmem:[#allocation5 + $0x48] sm:$0xff]  ;;  %v63_v29 = vld [vmem:[#allocation5 + $0x40] sm:$0xff]  ;;  %v94_v32 = vld [vmem:[#allocation5 + $0x138] sm:$0xff]  ;;  %v212_v16 = vstv %s336_s4 }
  0x15   :  { %146 = vmatpush.msra.mxu1 %v83_v15  ;;  %127 = vmatpush.msra.mxu0 %v66_v17  ;;  %v112_v26 = vld [vmem:[#allocation5 + $0x1c8] sm:$0xff]  ;;  %v111_v30 = vld [vmem:[#allocation5 + $0x1c0] sm:$0xff]  ;;  %v62_v33 = vld [vmem:[#allocation5 + $0x38] sm:$0xff] }
  0x16   :  { %187 = vmatpush.msra.mxu3 %v114_v18  ;;  %168 = vmatpush.msra.mxu2 %v97_v20  ;;  %v80_v27 = vld [vmem:[#allocation5 + $0xc8] sm:$0xff]  ;;  %v79_v31 = vld [vmem:[#allocation5 + $0xc0] sm:$0xff]  ;;  %v110_v34 = vld [vmem:[#allocation5 + $0x1b8] sm:$0xff] }
  0x17   :  { %147 = vmatpush.msra.mxu1 %v82_v19  ;;  %128 = vmatpush.msra.mxu0 %v65_v21  ;;  %v78_v35 = vld [vmem:[#allocation5 + $0xb8] sm:$0xff]  ;;  %v93_v36 = vld [vmem:[#allocation5 + $0x130] sm:$0xff]  ;;  %v92_v40 = vld [vmem:[#allocation5 + $0x128] sm:$0xff] }
  0x18   :  { %188 = vmatpush.msra.mxu3 %v113_v22  ;;  %169 = vmatpush.msra.mxu2 %v96_v24  ;;  %v61_v37 = vld [vmem:[#allocation5 + $0x30] sm:$0xff]  ;;  %v60_v41 = vld [vmem:[#allocation5 + $0x28] sm:$0xff]  ;;  %v91_v44 = vld [vmem:[#allocation5 + $0x120] sm:$0xff] }
  0x19   :  { %148 = vmatpush.msra.mxu1 %v81_v23  ;;  %129 = vmatpush.msra.mxu0 %v64_v25  ;;  %v109_v38 = vld [vmem:[#allocation5 + $0x1b0] sm:$0xff]  ;;  %v108_v42 = vld [vmem:[#allocation5 + $0x1a8] sm:$0xff]  ;;  %v59_v45 = vld [vmem:[#allocation5 + $0x20] sm:$0xff] }
  0x1a   :  { %189 = vmatpush.msra.mxu3 %v112_v26  ;;  %170 = vmatpush.msra.mxu2 %v95_v28  ;;  %v77_v39 = vld [vmem:[#allocation5 + $0xb0] sm:$0xff]  ;;  %v76_v43 = vld [vmem:[#allocation5 + $0xa8] sm:$0xff]  ;;  %v107_v46 = vld [vmem:[#allocation5 + $0x1a0] sm:$0xff] }
  0x1b   :  { %149 = vmatpush.msra.mxu1 %v80_v27  ;;  %130 = vmatpush.msra.mxu0 %v63_v29  ;;  %v75_v47 = vld [vmem:[#allocation5 + $0xa0] sm:$0xff]  ;;  %v90_v48 = vld [vmem:[#allocation5 + $0x118] sm:$0xff]  ;;  %v89_v52 = vld [vmem:[#allocation5 + $0x110] sm:$0xff] }
  0x1c   :  { %190 = vmatpush.msra.mxu3 %v111_v30  ;;  %171 = vmatpush.msra.mxu2 %v94_v32  ;;  %v58_v49 = vld [vmem:[#allocation5 + $0x18] sm:$0xff]  ;;  %v57_v53 = vld [vmem:[#allocation5 + $0x10] sm:$0xff]  ;;  %v88_v56 = vld [vmem:[#allocation5 + $0x108] sm:$0xff] }
  0x1d   :  { %150 = vmatpush.msra.mxu1 %v79_v31  ;;  %131 = vmatpush.msra.mxu0 %v62_v33  ;;  %v106_v50 = vld [vmem:[#allocation5 + $0x198] sm:$0xff]  ;;  %v105_v54 = vld [vmem:[#allocation5 + $0x190] sm:$0xff]  ;;  %v56_v57 = vld [vmem:[#allocation5 + $0x8] sm:$0xff] }
  0x1e   :  { %191 = vmatpush.msra.mxu3 %v110_v34  ;;  %172 = vmatpush.msra.mxu2 %v93_v36  ;;  %v74_v51 = vld [vmem:[#allocation5 + $0x98] sm:$0xff]  ;;  %v73_v55 = vld [vmem:[#allocation5 + $0x90] sm:$0xff]  ;;  %v104_v58 = vld [vmem:[#allocation5 + $0x188] sm:$0xff] }
  0x1f   :  { %151 = vmatpush.msra.mxu1 %v78_v35  ;;  %132 = vmatpush.msra.mxu0 %v61_v37  ;;  %v72_v59 = vld [vmem:[#allocation5 + $0x88] sm:$0xff]  ;;  %v87_v60 = vld [vmem:[#allocation5 + $0x100] sm:$0xff]  ;;  %v53_v62 = vld [vmem:[#allocation3 + $0x10] sm:$0xff] }
  0x20   :  { %192 = vmatpush.msra.mxu3 %v109_v38  ;;  %173 = vmatpush.msra.mxu2 %v92_v40  ;;  %v55_v61 = vld [vmem:[#allocation5] sm:$0xff]  ;;  %v54_v1 = vld [vmem:[#allocation3 + $0x18] sm:$0xff]  ;;  %v52_v3 = vld [vmem:[#allocation3 + $0x8] sm:$0xff] }
  0x21   :  { %152 = vmatpush.msra.mxu1 %v77_v39  ;;  %133 = vmatpush.msra.mxu0 %v60_v41  ;;  %v103_v63 = vld [vmem:[#allocation5 + $0x180] sm:$0xff] }
  0x22   :  { %193 = vmatpush.msra.mxu3 %v108_v42  ;;  %174 = vmatpush.msra.mxu2 %v91_v44  ;;  %v51_v0 = vld [vmem:[#allocation3] sm:$0xff] }
  0x23   :  { %153 = vmatpush.msra.mxu1 %v76_v43  ;;  %134 = vmatpush.msra.mxu0 %v59_v45  ;;  %v71_v2 = vld [vmem:[#allocation5 + $0x80] sm:$0xff] }
  0x24   :  { %194 = vmatpush.msra.mxu3 %v107_v46  ;;  %175 = vmatpush.msra.mxu2 %v90_v48  ;;  %v226_v4 = vld [vmem:[%s334_s2] ss:$0 sm:$0xff] }
  0x25   :  { %154 = vmatpush.msra.mxu1 %v75_v47  ;;  %135 = vmatpush.msra.mxu0 %v58_v49  ;;  %v227_v13 = vld [vmem:[%s335_s3] ss:$0 sm:$0xff] }
  0x26   :  { %195 = vmatpush.msra.mxu3 %v106_v50  ;;  %176 = vmatpush.msra.mxu2 %v89_v52 }
  0x27   :  { %155 = vmatpush.msra.mxu1 %v74_v51  ;;  %136 = vmatpush.msra.mxu0 %v57_v53 }
  0x28   :  { %196 = vmatpush.msra.mxu3 %v105_v54  ;;  %177 = vmatpush.msra.mxu2 %v88_v56 }
  0x29   :  { %156 = vmatpush.msra.mxu1 %v73_v55  ;;  %137 = vmatpush.msra.mxu0 %v56_v57 }
  0x2a   :  { %197 = vmatpush.msra.mxu3 %v104_v58  ;;  %178 = vmatpush.msra.mxu2 %v87_v60 }
  0x2b   :  { %157 = vmatpush.msra.mxu1 %v72_v59  ;;  %138 = vmatpush.msra.mxu0 %v55_v61 }
  0x2c   :  { %179 = vmatmul.f32.vlgmr.msra.gmra.mxu2 %v53_v62  ;;  %198 = vmatpush.msra.mxu3 %v103_v63 }
  0x2d   :  { %139 = vmatmul.f32.vlgmr.msra.gmra.mxu0 %v51_v0  ;;  %199 = vmatmul.f32.vlgmr.msra.gmra.mxu3 %v54_v1 }
  0x2e   :  { %158 = vmatpush.msra.mxu1 %v71_v2 }
  0x2f   :  { %159 = vmatmul.f32.vlgmr.msra.gmra.mxu1 %v52_v3 }
  0xaa   :  { %v140_v5 = vpop.f32.mrf.mxu0 }
  0xab   :  { %v141_v6 = vadd.f32 %v226_v4, %v140_v5 }
  0xac   :  { %v160_v7 = vpop.f32.mrf.mxu1 }
  0xad   :  { %v161_v8 = vadd.f32 %v160_v7, %v141_v6 }
  0xaf   :  { %v180_v9 = vpop.f32.mrf.mxu2 }
  0xb0   :  { %v181_v10 = vadd.f32 %v180_v9, %v161_v8  ;;  %v200_v11 = vpop.f32.mrf.mxu3 }
  0xb2   :  { %v201_v12 = vadd.f32 %v200_v11, %v181_v10 }
  0xb4   :  { %v203_v14 = vmax.f32 %v201_v12, 0.0 }
  0xb6   :  { %v208_v15 = vmul.f32 %v227_v13, %v203_v14 }
  0xb8   :  { %209 = vadd.xlane.f32.xlu0 %v208_v15 }
 0x12b   :  { %v210_v17 = vpop.xlane.xlu0 %209 }
 0x12c   :  { %v213_v18 = vadd.f32 %v212_v16, %v210_v17 }
 0x12e   :  { %215 = vst.msk [vmem:[%s337_s5] sm:$0xff] %vm214_vm0, %v213_v18 }
 0x12f   :  { %220 = vsyncpa [#allocation4], 1 }
 0x130   :  { %221 = vsyncpa [#allocation6], 1 }

</bundles_post_ra>
